<compile_context>
chip_gen: v7x
topology: tpu7x:2x2x1
jax: 0.10.0
libtpu: 0.0.40
codegen_flags: <defaults>
</compile_context>

<pallas_src>
import functools

import jax
import jax.numpy as jnp
from jax import lax
from jax.experimental import pallas as pl
from jax.experimental.pallas import tpu as pltpu

_LANE = 128
_SUBLANE = 8


def _round_up(x, m):
    return ((x + m - 1) // m) * m


def _decoder_kernel(x1_ref, x2_ref, x3_ref, w1_ref, w2_ref, b_ref, o_ref):
    # Elementwise abs-diffs (VPU) feeding two small MXU dots with f32 accumulation.
    d1 = jnp.abs(x1_ref[...] - x2_ref[...])          # (TB, E)
    d2 = jnp.abs(x2_ref[...] - x3_ref[...])          # (TB, E)
    # Contract on E: (2, E) x (TB, E) -> (2, TB)   (lane-dense output block).
    dn = (((1,), (1,)), ((), ()))
    acc = lax.dot_general(w1_ref[...], d1, dn, preferred_element_type=jnp.float32)
    acc = acc + lax.dot_general(w2_ref[...], d2, dn, preferred_element_type=jnp.float32)
    o_ref[...] = (acc + b_ref[...]).astype(o_ref.dtype)   # bias (2, 1) broadcasts


def prepare_params(weight, bias):
    """One-time weight prep (hoisted off the hot path).

    weight: (2, 2*E) as in nn.Linear; bias: (2,).
    Returns w1T, w2T of shape (2, E) and bias as (2, 1), all float32.
    """
    two, twoE = weight.shape
    assert two == 2 and twoE % 2 == 0
    E = twoE // 2
    w1t = weight[:, :E].astype(jnp.float32)           # (2, E)
    w2t = weight[:, E:].astype(jnp.float32)           # (2, E)
    b2d = bias.reshape(2, 1).astype(jnp.float32)      # (2, 1)
    return w1t, w2t, b2d


def cdisn_tsnet_decoder(x1, x2, x3, w1t, w2t, b2d, *, block_batch=2048):
    """x1/x2/x3: (B, E) unpadded; w1t/w2t: (2, E); b2d: (2, 1). Returns (B, 2) f32."""
    B, E = x1.shape
    assert x2.shape == (B, E) and x3.shape == (B, E)
    assert w1t.shape == (2, E) and w2t.shape == (2, E) and b2d.shape == (2, 1)

    # --- Batch tile selection (no input padding; ragged last block is masked). ---
    if B <= 2 * _LANE:
        # Single block equal to the full batch dim (legal for any B, incl. B < 8).
        tb = B
    else:
        # Multiple of 128 (required by the (2, TB) output block when TB != B),
        # capped by block_batch, and sized so the grid has >= 2 steps (v7x megacore).
        cap = max(_LANE, (block_batch // _LANE) * _LANE)
        tb = min(cap, _round_up(pl.cdiv(B, 2), _LANE))
    grid_b = pl.cdiv(B, tb)

    itemsize = jnp.dtype(x1.dtype).itemsize
    x_spec = pl.BlockSpec((tb, E), lambda i: (i, 0))
    w_spec = pl.BlockSpec((2, E), lambda i: (0, 0))     # resident in VMEM across steps
    b_spec = pl.BlockSpec((2, 1), lambda i: (0, 0))     # resident in VMEM across steps

    # Per-step VMEM: 3 inputs x double-buffer + d1/d2 temporaries (+ tiny w/b/out).
    est_vmem = (3 * 2 + 2) * tb * E * max(itemsize, 4)
    cp_kwargs = dict(dimension_semantics=("parallel",))
    if est_vmem > 12 * (1 << 20):   # only when block_batch is bumped past defaults
        cp_kwargs["vmem_limit_bytes"] = int(min(est_vmem * 1.5, 48 * (1 << 20)))

    cost = pl.CostEstimate(
        flops=12 * B * E,
        transcendentals=0,
        bytes_accessed=3 * B * E * itemsize + 2 * B * 4 + 2 * (2 * E + 1) * 4,
    )

    out_t = pl.pallas_call(
        _decoder_kernel,
        out_shape=jax.ShapeDtypeStruct((2, B), jnp.float32),
        grid=(grid_b,),
        in_specs=[x_spec, x_spec, x_spec, w_spec, w_spec, b_spec],
        out_specs=pl.BlockSpec((2, tb), lambda i: (0, i)),
        compiler_params=pltpu.CompilerParams(**cp_kwargs),
        cost_estimate=cost,
    )(x1, x2, x3, w1t, w2t, b2d)

    # Tiny (2, B) -> (B, 2) transpose outside the kernel (negligible vs. input DMA).
    return out_t.T


def _reference(x1, x2, x3, weight, bias):
    cat = jnp.concatenate([jnp.abs(x1 - x2), jnp.abs(x2 - x3)], axis=-1)
    return cat @ weight.T + bias


if __name__ == "__main__":
    embed_dim = 100
    batch = 8

    key = jax.random.PRNGKey(0)
    k1, k2, k3, kw, kb = jax.random.split(key, 5)

    x1 = jax.random.normal(k1, (batch, embed_dim), dtype=jnp.float32)
    x2 = jax.random.normal(k2, (batch, embed_dim), dtype=jnp.float32)
    x3 = jax.random.normal(k3, (batch, embed_dim), dtype=jnp.float32)

    # Deterministic parameter init mimicking nn.Linear's uniform(-1/sqrt(fan_in), ...)
    bound = 1.0 / jnp.sqrt(2.0 * embed_dim)
    weight = jax.random.uniform(kw, (2, 2 * embed_dim), jnp.float32, -bound, bound)
    bias = jax.random.uniform(kb, (2,), jnp.float32, -bound, bound)

    # One-time param prep (hoisted out of the forward hot path).
    w1t, w2t, b2d = prepare_params(weight, bias)
    w1t, w2t, b2d = jax.block_until_ready((w1t, w2t, b2d))

    fwd = jax.jit(functools.partial(cdisn_tsnet_decoder, w1t=w1t, w2t=w2t, b2d=b2d))
    out = jax.block_until_ready(fwd(x1, x2, x3))

    ref = _reference(x1, x2, x3, weight, bias)
    assert out.shape == (batch, 2)
    assert jnp.allclose(out, ref, atol=1e-4, rtol=1e-4)

    print("KERNEL_OK")
</pallas_src>

<mosaic_0001>
module attributes {stable_mosaic.version = 11 : i64} {
  func.func @_decoder_kernel(%arg0: i32, %arg1: memref<8x100xf32, #tpu.memory_space<vmem>>, %arg2: memref<8x100xf32, #tpu.memory_space<vmem>>, %arg3: memref<8x100xf32, #tpu.memory_space<vmem>>, %arg4: memref<2x100xf32, #tpu.memory_space<vmem>>, %arg5: memref<2x100xf32, #tpu.memory_space<vmem>>, %arg6: memref<2x1xf32, #tpu.memory_space<vmem>>, %arg7: memref<2x8xf32, #tpu.memory_space<vmem>>) attributes {dimension_semantics = [#tpu.dimension_semantics<parallel>], iteration_bounds = array<i64: 1>, scalar_prefetch = 0 : i64, scratch_operands = 0 : i64, tpu.core_type = #tpu.core_type<tc>, window_params = [{transform_indices = @transform_0, window_bounds = array<i64: 8, 100>}, {transform_indices = @transform_1, window_bounds = array<i64: 8, 100>}, {transform_indices = @transform_2, window_bounds = array<i64: 8, 100>}, {pipeline_mode = #tpu.pipeline_mode<synchronous>, transform_indices = @transform_3, window_bounds = array<i64: 2, 100>}, {pipeline_mode = #tpu.pipeline_mode<synchronous>, transform_indices = @transform_4, window_bounds = array<i64: 2, 100>}, {pipeline_mode = #tpu.pipeline_mode<synchronous>, transform_indices = @transform_5, window_bounds = array<i64: 2, 1>}, {transform_indices = @transform_6, window_bounds = array<i64: 2, 8>}]} {
    %c0 = arith.constant 0 : index
    %c0_0 = arith.constant 0 : index
    %0 = vector.load %arg1[%c0, %c0_0] : memref<8x100xf32, #tpu.memory_space<vmem>>, vector<8x100xf32>
    %c0_1 = arith.constant 0 : index
    %c0_2 = arith.constant 0 : index
    %1 = vector.load %arg2[%c0_1, %c0_2] : memref<8x100xf32, #tpu.memory_space<vmem>>, vector<8x100xf32>
    %2 = arith.subf %0, %1 : vector<8x100xf32>
    %3 = math.absf %2 : vector<8x100xf32>
    %c0_3 = arith.constant 0 : index
    %c0_4 = arith.constant 0 : index
    %4 = vector.load %arg2[%c0_3, %c0_4] : memref<8x100xf32, #tpu.memory_space<vmem>>, vector<8x100xf32>
    %c0_5 = arith.constant 0 : index
    %c0_6 = arith.constant 0 : index
    %5 = vector.load %arg3[%c0_5, %c0_6] : memref<8x100xf32, #tpu.memory_space<vmem>>, vector<8x100xf32>
    %6 = arith.subf %4, %5 : vector<8x100xf32>
    %7 = math.absf %6 : vector<8x100xf32>
    %c0_7 = arith.constant 0 : index
    %c0_8 = arith.constant 0 : index
    %8 = vector.load %arg4[%c0_7, %c0_8] : memref<2x100xf32, #tpu.memory_space<vmem>>, vector<2x100xf32>
    %cst = arith.constant dense<0.000000e+00> : vector<2x8xf32>
    %9 = tpu.matmul %8, %3, %cst {dimension_numbers = #tpu.dot_dimension_numbers<[1], [1], [0], [0], [0, 0, 1, 0], [], []>} : vector<2x100xf32>, vector<8x100xf32>, vector<2x8xf32> -> vector<2x8xf32>
    %c0_9 = arith.constant 0 : index
    %c0_10 = arith.constant 0 : index
    %10 = vector.load %arg5[%c0_9, %c0_10] : memref<2x100xf32, #tpu.memory_space<vmem>>, vector<2x100xf32>
    %cst_11 = arith.constant dense<0.000000e+00> : vector<2x8xf32>
    %11 = tpu.matmul %10, %7, %cst_11 {dimension_numbers = #tpu.dot_dimension_numbers<[1], [1], [0], [0], [0, 0, 1, 0], [], []>} : vector<2x100xf32>, vector<8x100xf32>, vector<2x8xf32> -> vector<2x8xf32>
    %12 = arith.addf %9, %11 : vector<2x8xf32>
    %c0_12 = arith.constant 0 : index
    %c0_13 = arith.constant 0 : index
    %13 = vector.load %arg6[%c0_12, %c0_13] : memref<2x1xf32, #tpu.memory_space<vmem>>, vector<2x1xf32>
    %14 = vector.broadcast %13 : vector<2x1xf32> to vector<2x8xf32>
    %15 = arith.addf %12, %14 : vector<2x8xf32>
    %c0_14 = arith.constant 0 : index
    %c0_15 = arith.constant 0 : index
    %16 = vector.load %arg7[%c0_14, %c0_15] : memref<2x8xf32, #tpu.memory_space<vmem>>, vector<2x8xf32>
    tpu.vector_store %arg7[%c0_14, %c0_15], %15 {strides = array<i32>} : memref<2x8xf32, #tpu.memory_space<vmem>>, vector<2x8xf32>,
    return
  }
  func.func @transform_0(%arg0: i32) -> (i32, i32) {
    %c0_i32 = arith.constant 0 : i32
    %c0_i32_0 = arith.constant 0 : i32
    return %arg0, %c0_i32 : i32, i32
  }
  func.func @transform_1(%arg0: i32) -> (i32, i32) {
    %c0_i32 = arith.constant 0 : i32
    %c0_i32_0 = arith.constant 0 : i32
    return %arg0, %c0_i32 : i32, i32
  }
  func.func @transform_2(%arg0: i32) -> (i32, i32) {
    %c0_i32 = arith.constant 0 : i32
    %c0_i32_0 = arith.constant 0 : i32
    return %arg0, %c0_i32 : i32, i32
  }
  func.func @transform_3(%arg0: i32) -> (i32, i32) {
    %c0_i32 = arith.constant 0 : i32
    %c0_i32_0 = arith.constant 0 : i32
    %c0_i32_1 = arith.constant 0 : i32
    return %c0_i32, %c0_i32_0 : i32, i32
  }
  func.func @transform_4(%arg0: i32) -> (i32, i32) {
    %c0_i32 = arith.constant 0 : i32
    %c0_i32_0 = arith.constant 0 : i32
    %c0_i32_1 = arith.constant 0 : i32
    return %c0_i32, %c0_i32_0 : i32, i32
  }
  func.func @transform_5(%arg0: i32) -> (i32, i32) {
    %c0_i32 = arith.constant 0 : i32
    %c0_i32_0 = arith.constant 0 : i32
    %c0_i32_1 = arith.constant 0 : i32
    return %c0_i32, %c0_i32_0 : i32, i32
  }
  func.func @transform_6(%arg0: i32) -> (i32, i32) {
    %c0_i32 = arith.constant 0 : i32
    %c0_i32_0 = arith.constant 0 : i32
    return %c0_i32, %arg0 : i32, i32
  }
}

</mosaic_0001>

<bundles_post_ra>
// kernel: cdisn_tsnet_decoder.1
= control target key start
LH: loop header
LB: loop body
LE: loop exit
PB: predicated region body
PF: predicated region fallthrough
CT: control target
= control target key end

     0   :  { %11 = vsyncpa [#allocation3], 0  ;;  %s465_s0 = inlined_call_operand.hbm [shape: f32[8,100], index: 0, kind: input, shape index: {}]   ;;  %s466_s1 = inlined_call_operand.hbm [shape: f32[8,100], index: 1, kind: input, shape index: {}]   ;;  %s467_s2 = inlined_call_operand.hbm [shape: f32[8,100], index: 2, kind: input, shape index: {}]   ;;  %s468_s3 = inlined_call_operand.vmem [shape: f32[2,100], index: 3, kind: input, shape index: {}]   ;;  %s469_s4 = inlined_call_operand.vmem [shape: f32[2,100], index: 4, kind: input, shape index: {}]   ;;  %s470_s5 = inlined_call_operand.vmem [shape: f32[2,1], index: 5, kind: input, shape index: {}]   ;;  %s471_s6 = inlined_call_operand.hbm [shape: f32[2,8], index: 6, kind: output, shape index: {}]  }
   0x1   :  { %12 = vsyncpa [#allocation6], 0 }
   0x2   :  { %13 = vsyncpa [#allocation4], 0  ;;  %s366_s21 = smov [#allocation5]   ;;  %s367_s23 = smov [#allocation2]  }
   0x3   :  { %s30_s22 = sshll.u32 %s366_s21, 4  ;;  %s20_s24 = sshll.u32 %s367_s23, 4  ;;  %s31_s22 = int_to_ptr.vmem [resolvable:$true] %s30_s22  ;;  %s21_s24 = int_to_ptr.vmem [resolvable:$true] %s20_s24 }
   0x4   :  { %s272_s27 = scalar_lea.hbm %s466_s1, 128 }
   0x5   :  { %p273_p0 = scmp.ne.s32.totalorder %s466_s1, %s272_s27  ;;  %p276_p1 = scmp.lt.u32.totalorder %s272_s27, %s466_s1 }
   0x7   :  { %p278_p2 = pnand %p276_p1, %p273_p0 }
   0x9   :  { %281 = shalt.err (!%p278_p2)
}
   0xa   :  { %s282_s8 = scalar_lea.vmem %s31_s22, 128  ;;  %p287_p4 = scmp.lt.s32.totalorder %s31_s22, %s31_s22 }
   0xb   :  { %p283_p3 = scmp.ne.s32.totalorder %s31_s22, %s282_s8  ;;  %p288_p5 = scmp.lt.s32.totalorder %s282_s8, %s282_s8 }
   0xd   :  { %p289_p6 = por %p288_p5, %p287_p4 }
   0xf   :  { %p290_p7 = pnand %p289_p6, %p283_p3 }
  0x11   :  { %293 = shalt.err (!%p290_p7)
}
  0x12   :  { %33 = dma.hbm_to_vmem [thread:$0]  %s466_s1, 128, %s31_s22, [#allocation6]  }
  0x13   :  { %s294_s13 = scalar_lea.hbm %s465_s0, 128 }
  0x14   :  { %p295_p8 = scmp.ne.s32.totalorder %s465_s0, %s294_s13  ;;  %p298_p9 = scmp.lt.u32.totalorder %s294_s13, %s465_s0 }
  0x16   :  { %p300_p10 = pnand %p298_p9, %p295_p8 }
  0x18   :  { %303 = shalt.err (!%p300_p10)
}
  0x19   :  { %s304_s18 = scalar_lea.vmem %s21_s24, 128  ;;  %p309_p12 = scmp.lt.s32.totalorder %s21_s24, %s21_s24 }
  0x1a   :  { %p305_p11 = scmp.ne.s32.totalorder %s21_s24, %s304_s18  ;;  %p310_p13 = scmp.lt.s32.totalorder %s304_s18, %s304_s18 }
  0x1c   :  { %p311_p0 = por %p310_p13, %p309_p12 }
  0x1e   :  { %p312_p1 = pnand %p311_p0, %p305_p11 }
  0x20   :  { %315 = shalt.err (!%p312_p1)
}
  0x21   :  { %23 = dma.hbm_to_vmem [thread:$0]  %s465_s0, 128, %s21_s24, [#allocation3]  }
  0x22   :  { %s368_s20 = smov [#allocation7]   ;;  %s316_s25 = scalar_lea.hbm %s467_s2, 128 }
  0x23   :  { %s40_s21 = sshll.u32 %s368_s20, 4  ;;  %p317_p2 = scmp.ne.s32.totalorder %s467_s2, %s316_s25  ;;  %s41_s21 = int_to_ptr.vmem [resolvable:$true] %s40_s21 }
  0x24   :  { %p320_p3 = scmp.lt.u32.totalorder %s316_s25, %s467_s2 }
  0x26   :  { %p322_p4 = pnand %p320_p3, %p317_p2 }
  0x28   :  { %325 = shalt.err (!%p322_p4)
}
  0x29   :  { %s326_s30 = scalar_lea.vmem %s41_s21, 128  ;;  %p331_p6 = scmp.lt.s32.totalorder %s41_s21, %s41_s21 }
  0x2a   :  { %p327_p5 = scmp.ne.s32.totalorder %s41_s21, %s326_s30  ;;  %p332_p7 = scmp.lt.s32.totalorder %s326_s30, %s326_s30 }
  0x2c   :  { %p333_p8 = por %p332_p7, %p331_p6 }
  0x2e   :  { %p334_p9 = pnand %p333_p8, %p327_p5 }
  0x30   :  { %337 = shalt.err (!%p334_p9)
}
  0x31   :  { %43 = dma.hbm_to_vmem [thread:$0]  %s467_s2, 128, %s41_s21, [#allocation6]  }
  0x32   :  { %360 = dma.done.wait [#allocation3], 128  }
  0x33   :  { %361 = vsyncadd [#allocation3], 4294967168 }
  0x34   :  { %362 = dma.done.wait [#allocation6], 256  }
  0x35   :  { %363 = vsyncadd [#allocation6], 4294967040  ;;  %v369_v0 = vmov 0.0   ;;  %vm370_vm0 = vmmov 0   ;;  %v371_v1 = vmov 0   ;;  %v60_v2 = vld [vmem:[#allocation5] sm:$0xff] }
  0x36   :  { %254 = vmatprep.subr.mxu0 %v369_v0  ;;  %259 = vmatprep.subr.mxu1 %v369_v0  ;;  %v63_v3 = vld [vmem:[#allocation7] sm:$0xff]  ;;  %v59_v4 = vld [vmem:[#allocation2] sm:$0xff]  ;;  %vm68_vm1 = vcmask 818176   ;;  %vm228_vm2 = vcmask 58368  }
  0x37   :  { %256 = vmatprep.mubr.msk.f32.mxu0 %vm370_vm0, %v369_v0  ;;  %261 = vmatprep.mubr.msk.f32.mxu1 %vm370_vm0, %v369_v0  ;;  %v64_v5 = vsub.f32 %v60_v2, %v63_v3  ;;  %v61_v6 = vsub.f32 %v59_v4, %v60_v2  ;;  %v221_v7 = vld [vmem:[%s470_s5] sm:$0x3]  ;;  %s372_s5 = smov [#allocation8]  }
  0x38   :  { %271 = vset.pattern.permute.xlu0 %v371_v1  ;;  %v67_v10 = vld [vmem:[%s469_s4] sm:$0x3]  ;;  %s236_s12 = sshll.u32 %s372_s5, 4  ;;  %s237_s12 = int_to_ptr.vmem [resolvable:$true] %s236_s12 }
  0x39   :  { %224 = vperm.xlu0 %271, %v221_v7   ;;  %v65_v8 = vand.u32 2147483647, %v64_v5  ;;  %v62_v9 = vand.u32 2147483647, %v61_v6  ;;  %v66_v11 = vld [vmem:[%s468_s3] sm:$0x3]  ;;  %p343_p11 = scmp.lt.s32.totalorder %s237_s12, %s237_s12 }
  0x3a   :  { %s338_s13 = scalar_lea.vmem %s237_s12, 32 }
  0x3b   :  { %255 = vmatpush3.xpose.msk.msra.mxu0 %vm68_vm1, %v65_v8  ;;  %260 = vmatpush3.xpose.msk.msra.mxu1 %vm68_vm1, %v62_v9  ;;  %p339_p10 = scmp.ne.s32.totalorder %s237_s12, %s338_s13  ;;  %p344_p12 = scmp.lt.s32.totalorder %s338_s13, %s338_s13 }
  0x3d   :  { %p345_p13 = por %p344_p12, %p343_p11 }
  0x3e   :  { %257 = vmatmul.mubr.msk.f32.vlgmr.msra.gmra.mrb[0].mxu0 %vm68_vm1, %v67_v10  ;;  %262 = vmatmul.mubr.msk.f32.vlgmr.msra.gmra.mrb[0].mxu1 %vm68_vm1, %v66_v11 }
  0x3f   :  { %p346_p0 = pnand %p345_p13, %p339_p10 }
  0xb8   :  { %v225_v12 = vpop.permute.xlu0 %224 }
 0x111   :  { %v141_v13 = vpop.f32.mrb[0].mxu0  ;;  %v217_v14 = vpop.f32.mrb[0].mxu1 }
 0x112   :  { %v218_v15 = vadd.f32 %v217_v14, %v141_v13  ;;  %v258_v16 = vpop.f32.mrb[1].mxu0  ;;  %v263_v17 = vpop.f32.mrb[1].mxu1 }
 0x114   :  { %v227_v18 = vadd.f32 %v225_v12, %v218_v15 }
 0x116   :  { %229 = vst.msk [vmem:[#allocation8] sm:$0x3] %vm228_vm2, %v227_v18 }
 0x117   :  { %349 = shalt.err (!%p346_p0)
}
 0x118   :  { %s350_s14 = scalar_lea.hbm %s471_s6, 32 }
 0x119   :  { %p351_p1 = scmp.ne.s32.totalorder %s471_s6, %s350_s14  ;;  %p354_p2 = scmp.lt.u32.totalorder %s350_s14, %s471_s6 }
 0x11b   :  { %p356_p3 = pnand %p354_p2, %p351_p1 }
 0x11d   :  { %359 = shalt.err (!%p356_p3)
}
 0x11e   :  { %239 = dma.vmem_to_hbm [thread:$0]  %s237_s12, 32, %s471_s6, [#allocation4]  }
 0x11f   :  { %364 = dma.done.wait [#allocation4], 32  }
 0x120   :  { %365 = vsyncadd [#allocation4], 4294967264 }
 0x121   :  { %243 = vsyncpa [#allocation3], 1 }
 0x122   :  { %244 = vsyncpa [#allocation6], 1 }
 0x123   :  { %245 = vsyncpa [#allocation4], 1 }

</bundles_post_ra>
